<compile_context>
chip_gen: v7x
topology: tpu7x:2x2x1
jax: 0.10.0
libtpu: 0.0.40
codegen_flags: <defaults>
</compile_context>

<pallas_src>
import jax
import jax.numpy as jnp
from jax.experimental import pallas as pl
from jax.experimental.pallas import tpu as pltpu


def _round_up(x, m):
    return ((x + m - 1) // m) * m


def _vmem_config():
    """(fast_path_budget, fast_path_vmem_limit, tiled_vmem_limit) in bytes."""
    try:
        kind = jax.devices()[0].device_kind.lower()
    except Exception:
        kind = ""
    if "v5" in kind:
        # v5e: 16 MiB default scoped VMEM — stay comfortably under it.
        return (10 << 20, 14 << 20, 14 << 20)
    # v6e (32/128 MiB) and v7x (32/64 MiB): leave headroom for Mosaic scratch.
    return (24 << 20, 30 << 20, 30 << 20)


# --------------------------------------------------------------------------
# Kernels
# --------------------------------------------------------------------------
def _linear_bias_kernel(x_ref, w_ref, b_ref, o_ref):
    # x_ref: (tb, F), w_ref: (F, tn), b_ref: (1, tn), o_ref: (tb, tn).
    acc = jnp.dot(x_ref[...], w_ref[...], preferred_element_type=jnp.float32)
    o_ref[...] = (acc + b_ref[...].astype(jnp.float32)).astype(o_ref.dtype)


def _linear_bias_acc_kernel(x_ref, w_ref, b_ref, o_ref, acc_ref):
    # Multi-k path: grid = (B//tb, N//tn, F//tk); contraction axis (k) last.
    k = pl.program_id(2)

    @pl.when(k == 0)
    def _():
        # Fold the bias into the accumulator init (saves one (tb,tn) VPU add).
        acc_ref[...] = jnp.broadcast_to(
            b_ref[...].astype(jnp.float32), acc_ref.shape
        )

    acc_ref[...] += jnp.dot(
        x_ref[...], w_ref[...], preferred_element_type=jnp.float32
    )

    @pl.when(k == pl.num_programs(2) - 1)
    def _():
        o_ref[...] = acc_ref[...].astype(o_ref.dtype)


# --------------------------------------------------------------------------
# Wrapper
# --------------------------------------------------------------------------
def reg_forward(x, w, b, *, force_tiled=False):
    """Pallas implementation of Reg.forward: x @ w + b.

    x: [B, F] float32
    w: [F, N] float32 (transposed PyTorch nn.Linear weight)
    b: [N]    float32
    """
    B, F = x.shape
    F2, N = w.shape
    assert F == F2 and b.shape == (N,)

    out_dtype = x.dtype
    elem = jnp.dtype(x.dtype).itemsize
    b2 = b.reshape(1, N)

    fast_budget, fast_vmem_limit, tiled_vmem_limit = _vmem_config()

    cost = pl.CostEstimate(
        flops=2 * B * F * N,
        transcendentals=0,
        bytes_accessed=elem * (B * F + F * N + N + B * N),
    )

    # Layout-padded working-set estimate for the single-block path.
    b_pad8 = _round_up(max(B, 1), 8)
    f_pad128 = _round_up(F, 128)
    n_pad128 = _round_up(N, 128)
    single_block_bytes = elem * (
        b_pad8 * f_pad128 + f_pad128 * n_pad128 + n_pad128 + b_pad8 * n_pad128
    )

    if single_block_bytes <= fast_budget and not force_tiled:
        # ---- Fast path: one resident block, no grid, one matmul + bias. ----
        return pl.pallas_call(
            _linear_bias_kernel,
            out_shape=jax.ShapeDtypeStruct((B, N), out_dtype),
            in_specs=[
                pl.BlockSpec((B, F), lambda: (0, 0)),
                pl.BlockSpec((F, N), lambda: (0, 0)),
                pl.BlockSpec((1, N), lambda: (0, 0)),
            ],
            out_specs=pl.BlockSpec((B, N), lambda: (0, 0)),
            compiler_params=pltpu.CompilerParams(
                vmem_limit_bytes=fast_vmem_limit
            ),
            cost_estimate=cost,
        )(x, w, b2)

    # ---- Tiled path: bounded, (8,128)-aligned tiles; ragged dims padded. ----
    # Worst case (tb=256, tn=1024, tk=512, f32): ~5.3 MiB double-buffered
    # inputs + 2 MiB double-buffered output + 1 MiB acc ≈ 8.3 MiB — fits the
    # v5e 16 MiB scoped limit and leaves plenty of headroom on v6e/v7x.
    tb = min(256, _round_up(B, 8))
    tk = min(512, _round_up(F, 128))
    tn = min(1024, _round_up(N, 128))

    # v7x megacore: prefer a parallel grid axis of extent >= 2 when possible.
    if (
        _round_up(B, tb) // tb == 1
        and _round_up(N, tn) // tn == 1
        and tn >= 256
    ):
        tn = max(128, ((tn // 2) // 128) * 128)

    Bp = _round_up(B, tb)
    Fp = _round_up(F, tk)
    Np = _round_up(N, tn)

    xp = x if (Bp == B and Fp == F) else jnp.pad(x, ((0, Bp - B), (0, Fp - F)))
    wp = w if (Fp == F and Np == N) else jnp.pad(w, ((0, Fp - F), (0, Np - N)))
    bp = b2 if Np == N else jnp.pad(b2, ((0, 0), (0, Np - N)))

    kt = Fp // tk
    if kt == 1:
        # Single contraction step: no accumulator scratch, only parallel axes.
        out_p = pl.pallas_call(
            _linear_bias_kernel,
            out_shape=jax.ShapeDtypeStruct((Bp, Np), out_dtype),
            grid_spec=pltpu.PrefetchScalarGridSpec(
                num_scalar_prefetch=0,
                grid=(Bp // tb, Np // tn),
                in_specs=[
                    pl.BlockSpec((tb, tk), lambda i, j: (i, 0)),
                    pl.BlockSpec((tk, tn), lambda i, j: (0, j)),
                    pl.BlockSpec((1, tn), lambda i, j: (0, j)),
                ],
                out_specs=pl.BlockSpec((tb, tn), lambda i, j: (i, j)),
            ),
            compiler_params=pltpu.CompilerParams(
                dimension_semantics=("parallel", "parallel"),
                vmem_limit_bytes=tiled_vmem_limit,
            ),
            cost_estimate=cost,
        )(xp, wp, bp)
    else:
        out_p = pl.pallas_call(
            _linear_bias_acc_kernel,
            out_shape=jax.ShapeDtypeStruct((Bp, Np), out_dtype),
            grid_spec=pltpu.PrefetchScalarGridSpec(
                num_scalar_prefetch=0,
                grid=(Bp // tb, Np // tn, kt),
                in_specs=[
                    pl.BlockSpec((tb, tk), lambda i, j, k: (i, k)),   # x tile
                    pl.BlockSpec((tk, tn), lambda i, j, k: (k, j)),   # w tile
                    pl.BlockSpec((1, tn), lambda i, j, k: (0, j)),    # bias
                ],
                out_specs=pl.BlockSpec((tb, tn), lambda i, j, k: (i, j)),
                scratch_shapes=[pltpu.VMEM((tb, tn), jnp.float32)],
            ),
            compiler_params=pltpu.CompilerParams(
                dimension_semantics=("parallel", "parallel", "arbitrary"),
                vmem_limit_bytes=tiled_vmem_limit,
            ),
            cost_estimate=cost,
        )(xp, wp, bp)

    if (Bp, Np) != (B, N):
        out_p = out_p[:B, :N]
    return out_p


def init_params(key, feature_dim, out_dim=2048, dtype=jnp.float32):
    # nn.init.xavier_normal_ on the Linear weight: std = sqrt(2/(fan_in+fan_out));
    # bias zero-initialized (init_weights).
    std = (2.0 / (feature_dim + out_dim)) ** 0.5
    w = std * jax.random.normal(key, (feature_dim, out_dim), dtype=dtype)
    b = jnp.zeros((out_dim,), dtype=dtype)
    return w, b


if __name__ == "__main__":
    key = jax.random.PRNGKey(0)
    kx, kw, kx2, kw2 = jax.random.split(key, 4)

    # --- primary demo (fast single-block path) ---
    batch, feature_dim, out_dim = 8, 32, 2048
    x = jax.random.normal(kx, (batch, feature_dim), dtype=jnp.float32)
    w, b = init_params(kw, feature_dim, out_dim)

    out = reg_forward(x, w, b)
    out = jax.block_until_ready(out)
    ref = x @ w + b[None, :]
    assert out.shape == (batch, out_dim)
    assert jnp.allclose(out, ref, atol=1e-5, rtol=1e-5)

    # --- exercise the tiled / accumulator path (ragged F -> padded, kt=2) ---
    b2_, f2_, n2_ = 16, 640, 2048
    x2 = jax.random.normal(kx2, (b2_, f2_), dtype=jnp.float32)
    w2, bias2 = init_params(kw2, f2_, n2_)
    out2 = reg_forward(x2, w2, bias2, force_tiled=True)
    out2 = jax.block_until_ready(out2)
    ref2 = x2 @ w2 + bias2[None, :]
    assert out2.shape == (b2_, n2_)
    assert jnp.allclose(out2, ref2, atol=1e-4, rtol=1e-4)

    print("KERNEL_OK")
</pallas_src>

<mosaic_0001>
module attributes {stable_mosaic.version = 11 : i64} {
  func.func @_linear_bias_kernel(%arg0: memref<8x32xf32, #tpu.memory_space<vmem>>, %arg1: memref<32x2048xf32, #tpu.memory_space<vmem>>, %arg2: memref<1x2048xf32, #tpu.memory_space<vmem>>, %arg3: memref<8x2048xf32, #tpu.memory_space<vmem>>) attributes {dimension_semantics = [], scalar_prefetch = 0 : i64, scratch_operands = 0 : i64, tpu.core_type = #tpu.core_type<tc>} {
    %c0 = arith.constant 0 : index
    %c0_0 = arith.constant 0 : index
    %0 = vector.load %arg0[%c0, %c0_0] : memref<8x32xf32, #tpu.memory_space<vmem>>, vector<8x32xf32>
    %c0_1 = arith.constant 0 : index
    %c0_2 = arith.constant 0 : index
    %1 = vector.load %arg1[%c0_1, %c0_2] : memref<32x2048xf32, #tpu.memory_space<vmem>>, vector<32x2048xf32>
    %cst = arith.constant dense<0.000000e+00> : vector<8x2048xf32>
    %2 = tpu.matmul %0, %1, %cst {dimension_numbers = #tpu.dot_dimension_numbers<[1], [0], [0], [1], [0, 0, 1, 1], [], []>} : vector<8x32xf32>, vector<32x2048xf32>, vector<8x2048xf32> -> vector<8x2048xf32>
    %c0_3 = arith.constant 0 : index
    %c0_4 = arith.constant 0 : index
    %3 = vector.load %arg2[%c0_3, %c0_4] : memref<1x2048xf32, #tpu.memory_space<vmem>>, vector<1x2048xf32>
    %4 = vector.broadcast %3 : vector<1x2048xf32> to vector<8x2048xf32>
    %5 = arith.addf %2, %4 : vector<8x2048xf32>
    %c0_5 = arith.constant 0 : index
    %c0_6 = arith.constant 0 : index
    %6 = vector.load %arg3[%c0_5, %c0_6] : memref<8x2048xf32, #tpu.memory_space<vmem>>, vector<8x2048xf32>
    tpu.vector_store %arg3[%c0_5, %c0_6], %5 {strides = array<i32>} : memref<8x2048xf32, #tpu.memory_space<vmem>>, vector<8x2048xf32>,
    return
  }
}

</mosaic_0001>

<bundles_post_ra>
// kernel: tpu_custom_call.1
= control target key start
LH: loop header
LB: loop body
LE: loop exit
PB: predicated region body
PF: predicated region fallthrough
CT: control target
= control target key end

     0   :  { %8 = vsyncpa [#allocation3], 0  ;;  %s1089_s0 = inlined_call_operand.hbm [shape: f32[8,32], index: 0, kind: input, shape index: {}]   ;;  %s1090_s1 = inlined_call_operand.hbm [shape: f32[32,2048], index: 1, kind: input, shape index: {}]   ;;  %s1091_s2 = inlined_call_operand.hbm [shape: f32[1,2048], index: 2, kind: input, shape index: {}]   ;;  %s1092_s3 = inlined_call_operand.hbm [shape: f32[8,2048], index: 3, kind: output, shape index: {}]  }
   0x1   :  { %9 = vsyncpa [#allocation6], 0 }
   0x2   :  { %10 = vsyncpa [#allocation4], 0  ;;  %s978_s12 = smov [#allocation5]   ;;  %s884_s16 = scalar_lea.hbm %s1090_s1, 8192 }
   0x3   :  { %s26_s13 = sshll.u32 %s978_s12, 4  ;;  %p885_p0 = scmp.ne.s32.totalorder %s1090_s1, %s884_s16  ;;  %s27_s13 = int_to_ptr.vmem [resolvable:$true] %s26_s13 }
   0x4   :  { %p888_p1 = scmp.lt.u32.totalorder %s884_s16, %s1090_s1 }
   0x6   :  { %p890_p2 = pnand %p888_p1, %p885_p0 }
   0x8   :  { %893 = shalt.err (!%p890_p2)
}
   0x9   :  { %s894_s21 = scalar_lea.vmem %s27_s13, 8192  ;;  %p899_p4 = scmp.lt.s32.totalorder %s27_s13, %s27_s13 }
   0xa   :  { %p895_p3 = scmp.ne.s32.totalorder %s27_s13, %s894_s21  ;;  %p900_p5 = scmp.lt.s32.totalorder %s894_s21, %s894_s21 }
   0xc   :  { %p901_p6 = por %p900_p5, %p899_p4 }
   0xe   :  { %p902_p7 = pnand %p901_p6, %p895_p3 }
  0x10   :  { %905 = shalt.err (!%p902_p7)
}
  0x11   :  { %s979_s22 = smov 2048   ;;  %s980_s23 = smov 128  }
  0x12   :  { %32 = dma.hbm_to_vmem [thread:$0]  %s1090_s1, 8192, %s27_s13, [#allocation6], %s979_s22, %s979_s22, %s980_s23  }
  0x13   :  { %s981_s26 = smov [#allocation2]   ;;  %s982_s28 = smov [#allocation7]  }
  0x14   :  { %s17_s27 = sshll.u32 %s981_s26, 4  ;;  %s39_s29 = sshll.u32 %s982_s28, 4  ;;  %s18_s27 = int_to_ptr.vmem [resolvable:$true] %s17_s27  ;;  %s40_s29 = int_to_ptr.vmem [resolvable:$true] %s39_s29 }
  0x15   :  { %s906_s5 = scalar_lea.hbm %s1089_s0, 128 }
  0x16   :  { %p907_p8 = scmp.ne.s32.totalorder %s1089_s0, %s906_s5  ;;  %p910_p9 = scmp.lt.u32.totalorder %s906_s5, %s1089_s0 }
  0x18   :  { %p912_p10 = pnand %p910_p9, %p907_p8 }
  0x1a   :  { %915 = shalt.err (!%p912_p10)
}
  0x1b   :  { %s916_s1 = scalar_lea.vmem %s18_s27, 128  ;;  %p921_p12 = scmp.lt.s32.totalorder %s18_s27, %s18_s27 }
  0x1c   :  { %p917_p11 = scmp.ne.s32.totalorder %s18_s27, %s916_s1  ;;  %p922_p13 = scmp.lt.s32.totalorder %s916_s1, %s916_s1 }
  0x1e   :  { %p923_p0 = por %p922_p13, %p921_p12 }
  0x20   :  { %p924_p1 = pnand %p923_p0, %p917_p11 }
  0x22   :  { %927 = shalt.err (!%p924_p1)
}
  0x23   :  { %20 = dma.hbm_to_vmem [thread:$0]  %s1089_s0, 128, %s18_s27, [#allocation3]  }
  0x24   :  { %s928_s14 = scalar_lea.hbm %s1091_s2, 256 }
  0x25   :  { %p929_p2 = scmp.ne.s32.totalorder %s1091_s2, %s928_s14  ;;  %p932_p3 = scmp.lt.u32.totalorder %s928_s14, %s1091_s2 }
  0x27   :  { %p934_p4 = pnand %p932_p3, %p929_p2 }
  0x29   :  { %937 = shalt.err (!%p934_p4)
}
  0x2a   :  { %s938_s19 = scalar_lea.vmem %s40_s29, 256  ;;  %p943_p6 = scmp.lt.s32.totalorder %s40_s29, %s40_s29 }
  0x2b   :  { %p939_p5 = scmp.ne.s32.totalorder %s40_s29, %s938_s19  ;;  %p944_p7 = scmp.lt.s32.totalorder %s938_s19, %s938_s19 }
  0x2d   :  { %p945_p8 = por %p944_p7, %p943_p6 }
  0x2f   :  { %p946_p9 = pnand %p945_p8, %p939_p5 }
  0x31   :  { %949 = shalt.err (!%p946_p9)
}
  0x32   :  { %42 = dma.hbm_to_vmem [thread:$0]  %s1091_s2, 256, %s40_s29, [#allocation6]  }
  0x33   :  { %972 = dma.done.wait [#allocation3], 128  }
  0x34   :  { %973 = vsyncadd [#allocation3], 4294967168 }
  0x35   :  { %974 = dma.done.wait [#allocation6], 8448  }
  0x36   :  { %975 = vsyncadd [#allocation6], 4294958848  ;;  %v983_v0 = vmov 0.0   ;;  %v54_v1 = vld [vmem:[#allocation5 + $0x8] sm:$0xff]  ;;  %v56_v3 = vld [vmem:[#allocation5 + $0x18] sm:$0xff]  ;;  %vm201_vm0 = vcmask 261120  }
  0x37   :  { %269 = vmatprep.mubr.f32.mxu0 %v983_v0  ;;  %340 = vmatprep.mubr.f32.mxu1 %v983_v0  ;;  %v70_v2 = vld [vmem:[#allocation5 + $0x88] sm:$0xff]  ;;  %v72_v5 = vld [vmem:[#allocation5 + $0x98] sm:$0xff]  ;;  %v53_v6 = vld [vmem:[#allocation5] sm:$0xff]  ;;  %s984_s2 = smov [#allocation8]  }
  0x38   :  { %v813_v4 = vpack.c.bf16 %v70_v2, %v54_v1  ;;  %v69_v7 = vld [vmem:[#allocation5 + $0x80] sm:$0xff]  ;;  %v821_v8 = vpack.c.bf16 %v72_v5, %v56_v3  ;;  %v55_v10 = vld [vmem:[#allocation5 + $0x10] sm:$0xff]  ;;  %v86_v12 = vld [vmem:[#allocation5 + $0x108] sm:$0xff]  ;;  %s795_s21 = sshll.u32 %s984_s2, 4  ;;  %s796_s21 = int_to_ptr.vmem [resolvable:$true] %s795_s21 }
  0x39   :  { %v815_v9 = vpack.c.bf16 %v69_v7, %v53_v6  ;;  %v71_v11 = vld [vmem:[#allocation5 + $0x90] sm:$0xff]  ;;  %v102_v14 = vld [vmem:[#allocation5 + $0x188] sm:$0xff]  ;;  %v88_v15 = vld [vmem:[#allocation5 + $0x118] sm:$0xff]  ;;  %s950_s22 = scalar_lea.vmem %s796_s21, 2048  ;;  %p955_p11 = scmp.lt.s32.totalorder %s796_s21, %s796_s21 }
  0x3a   :  { %814 = vmatprep.subr.bf16.mxu0 %v813_v4  ;;  %v823_v13 = vpack.c.bf16 %v71_v11, %v55_v10  ;;  %v104_v16 = vld [vmem:[#allocation5 + $0x198] sm:$0xff]  ;;  %822 = vmatprep.subr.bf16.mxu1 %v821_v8  ;;  %v817_v17 = vpack.c.bf16 %v102_v14, %v86_v12  ;;  %v85_v19 = vld [vmem:[#allocation5 + $0x100] sm:$0xff]  ;;  %v87_v21 = vld [vmem:[#allocation5 + $0x110] sm:$0xff]  ;;  %p951_p10 = scmp.ne.s32.totalorder %s796_s21, %s950_s22  ;;  %p956_p12 = scmp.lt.s32.totalorder %s950_s22, %s950_s22 }
  0x3b   :  { %816 = vmatpush1.bf16.msra.mxu0 %v815_v9  ;;  %v825_v18 = vpack.c.bf16 %v104_v16, %v88_v15  ;;  %v101_v20 = vld [vmem:[#allocation5 + $0x180] sm:$0xff]  ;;  %v103_v23 = vld [vmem:[#allocation5 + $0x190] sm:$0xff]  ;;  %v58_v24 = vld [vmem:[#allocation5 + $0x28] sm:$0xff] }
  0x3c   :  { %824 = vmatpush1.bf16.msra.mxu1 %v823_v13  ;;  %v819_v22 = vpack.c.bf16 %v101_v20, %v85_v19  ;;  %818 = vmatprep.subr.bf16.mxu0 %v817_v17  ;;  %v827_v25 = vpack.c.bf16 %v103_v23, %v87_v21  ;;  %v1043_v26 = vld [vmem:[#allocation2] sm:$0xff]  ;;  %v74_v27 = vld [vmem:[#allocation5 + $0xa8] sm:$0xff]  ;;  %v57_v32 = vld [vmem:[#allocation5 + $0x20] sm:$0xff]  ;;  %p957_p13 = por %p956_p12, %p955_p11 }
  0x3d   :  { %826 = vmatprep.subr.bf16.mxu1 %v825_v18  ;;  %v60_v28 = vld [vmem:[#allocation5 + $0x38] sm:$0xff]  ;;  %v829_v30 = vpack.c.bf16 %v74_v27, %v58_v24  ;;  %v73_v33 = vld [vmem:[#allocation5 + $0xa0] sm:$0xff]  ;;  %v59_v34 = vld [vmem:[#allocation5 + $0x30] sm:$0xff] }
  0x3e   :  { %v76_v29 = vld [vmem:[#allocation5 + $0xb8] sm:$0xff]  ;;  %v831_v35 = vpack.c.bf16 %v73_v33, %v57_v32  ;;  %v75_v36 = vld [vmem:[#allocation5 + $0xb0] sm:$0xff]  ;;  %v90_v37 = vld [vmem:[#allocation5 + $0x128] sm:$0xff]  ;;  %p958_p0 = pnand %p957_p13, %p951_p10 }
  0x3f   :  { %v837_v31 = vpack.c.bf16 %v76_v29, %v60_v28  ;;  %820 = vmatpush1.bf16.msra.mxu0 %v819_v22  ;;  %v106_v38 = vld [vmem:[#allocation5 + $0x1a8] sm:$0xff]  ;;  %v839_v39 = vpack.c.bf16 %v75_v36, %v59_v34  ;;  %v92_v41 = vld [vmem:[#allocation5 + $0x138] sm:$0xff]  ;;  %v89_v43 = vld [vmem:[#allocation5 + $0x120] sm:$0xff]  ;;  %v121_v36 = vlaneseq }
  0x40   :  { %828 = vmatpush1.bf16.msra.mxu1 %v827_v25  ;;  %830 = vmatprep.subr.bf16.mxu0 %v829_v30  ;;  %v833_v40 = vpack.c.bf16 %v106_v38, %v90_v37  ;;  %v108_v42 = vld [vmem:[#allocation5 + $0x1b8] sm:$0xff]  ;;  %v105_v45 = vld [vmem:[#allocation5 + $0x1a0] sm:$0xff]  ;;  %v91_v46 = vld [vmem:[#allocation5 + $0x130] sm:$0xff] }
  0x41   :  { %838 = vmatprep.subr.bf16.mxu1 %v837_v31  ;;  %v841_v44 = vpack.c.bf16 %v108_v42, %v92_v41  ;;  %v107_v47 = vld [vmem:[#allocation5 + $0x1b0] sm:$0xff]  ;;  %v62_v48 = vld [vmem:[#allocation5 + $0x48] sm:$0xff]  ;;  %v64_v50 = vld [vmem:[#allocation5 + $0x58] sm:$0xff]  ;;  %v835_v51 = vpack.c.bf16 %v105_v45, %v89_v43  ;;  %v1067_v37 = vshrl.u32 %v121_v36, 7 }
  0x42   :  { %805 = vmatmul.mubr.msk.f32.vlgmr.msra.gmra.mrb[0].mxu0 %vm201_vm0, %v1043_v26  ;;  %v78_v49 = vld [vmem:[#allocation5 + $0xc8] sm:$0xff]  ;;  %v80_v52 = vld [vmem:[#allocation5 + $0xd8] sm:$0xff]  ;;  %v843_v53 = vpack.c.bf16 %v107_v47, %v91_v46  ;;  %v61_v55 = vld [vmem:[#allocation5 + $0x40] sm:$0xff] }
  0x43   :  { %806 = vmatmul.mubr.msk.f32.vlgmr.msra.gmra.mrb[0].mxu1 %vm201_vm0, %v1043_v26  ;;  %832 = vmatpush1.bf16.msra.mxu0 %v831_v35  ;;  %v845_v54 = vpack.c.bf16 %v78_v49, %v62_v48  ;;  %v77_v56 = vld [vmem:[#allocation5 + $0xc0] sm:$0xff]  ;;  %v63_v57 = vld [vmem:[#allocation5 + $0x50] sm:$0xff]  ;;  %v853_v58 = vpack.c.bf16 %v80_v52, %v64_v50  ;;  %v94_v60 = vld [vmem:[#allocation5 + $0x148] sm:$0xff]  ;;  %v123_v38 = vsub.s32 0, %v1067_v37  ;;  %v127_v41 = vsub.s32 1, %v1067_v37 }
  0x44   :  { %840 = vmatpush1.bf16.msra.mxu1 %v839_v39  ;;  %834 = vmatprep.subr.bf16.mxu0 %v833_v40  ;;  %v79_v59 = vld [vmem:[#allocation5 + $0xd0] sm:$0xff]  ;;  %v110_v61 = vld [vmem:[#allocation5 + $0x1c8] sm:$0xff]  ;;  %v96_v62 = vld [vmem:[#allocation5 + $0x158] sm:$0xff]  ;;  %v847_v1 = vpack.c.bf16 %v77_v56, %v61_v55  ;;  %v131_v40 = vsub.s32 2, %v1067_v37  ;;  %v139_v49 = vsub.s32 4, %v1067_v37  ;;  %v151_v56 = vsub.s32 7, %v1067_v37 }
  0x45   :  { %842 = vmatprep.subr.bf16.mxu1 %v841_v44  ;;  %411 = vmatprep.mubr.f32.mxu0 %v983_v0  ;;  %v112_v63 = vld [vmem:[#allocation5 + $0x1d8] sm:$0xff]  ;;  %v855_v2 = vpack.c.bf16 %v79_v59, %v63_v57  ;;  %v849_v3 = vpack.c.bf16 %v110_v61, %v94_v60  ;;  %v93_v4 = vld [vmem:[#allocation5 + $0x140] sm:$0xff]  ;;  %v95_v6 = vld [vmem:[#allocation5 + $0x150] sm:$0xff] }
  0x46   :  { %482 = vmatprep.mubr.f32.mxu1 %v983_v0  ;;  %v109_v5 = vld [vmem:[#allocation5 + $0x1c0] sm:$0xff]  ;;  %v857_v7 = vpack.c.bf16 %v112_v63, %v96_v62  ;;  %v111_v8 = vld [vmem:[#allocation5 + $0x1d0] sm:$0xff]  ;;  %v66_v9 = vld [vmem:[#allocation5 + $0x68] sm:$0xff] }
  0x47   :  { %836 = vmatpush1.bf16.msra.mxu0 %v835_v51  ;;  %v82_v10 = vld [vmem:[#allocation5 + $0xe8] sm:$0xff]  ;;  %v68_v11 = vld [vmem:[#allocation5 + $0x78] sm:$0xff]  ;;  %v851_v13 = vpack.c.bf16 %v109_v5, %v93_v4  ;;  %v859_v14 = vpack.c.bf16 %v111_v8, %v95_v6  ;;  %v65_v16 = vld [vmem:[#allocation5 + $0x60] sm:$0xff] }
  0x48   :  { %844 = vmatpush1.bf16.msra.mxu1 %v843_v53  ;;  %846 = vmatprep.subr.bf16.mxu0 %v845_v54  ;;  %v84_v12 = vld [vmem:[#allocation5 + $0xf8] sm:$0xff]  ;;  %v861_v15 = vpack.c.bf16 %v82_v10, %v66_v9  ;;  %v81_v17 = vld [vmem:[#allocation5 + $0xe0] sm:$0xff]  ;;  %v67_v18 = vld [vmem:[#allocation5 + $0x70] sm:$0xff]  ;;  %v147_v53 = vsub.s32 6, %v1067_v37  ;;  %v143_v54 = vsub.s32 5, %v1067_v37 }
  0x49   :  { %854 = vmatprep.subr.bf16.mxu1 %v853_v58  ;;  %v869_v19 = vpack.c.bf16 %v84_v12, %v68_v11  ;;  %v83_v20 = vld [vmem:[#allocation5 + $0xf0] sm:$0xff]  ;;  %v98_v21 = vld [vmem:[#allocation5 + $0x168] sm:$0xff]  ;;  %v100_v23 = vld [vmem:[#allocation5 + $0x178] sm:$0xff]  ;;  %v863_v25 = vpack.c.bf16 %v81_v17, %v65_v16 }
  0x4a   :  { %807 = vmatmul.mubr.msk.f32.vlgmr.msra.gmra.mrb[2].mxu0 %vm201_vm0, %v1043_v26  ;;  %v114_v22 = vld [vmem:[#allocation5 + $0x1e8] sm:$0xff]  ;;  %v116_v24 = vld [vmem:[#allocation5 + $0x1f8] sm:$0xff]  ;;  %v871_v27 = vpack.c.bf16 %v83_v20, %v67_v18  ;;  %v97_v29 = vld [vmem:[#allocation5 + $0x160] sm:$0xff] }
  0x4b   :  { %808 = vmatmul.mubr.msk.f32.vlgmr.msra.gmra.mrb[2].mxu1 %vm201_vm0, %v1043_v26  ;;  %848 = vmatpush1.bf16.msra.mxu0 %v847_v1  ;;  %v865_v28 = vpack.c.bf16 %v114_v22, %v98_v21  ;;  %v113_v30 = vld [vmem:[#allocation5 + $0x1e0] sm:$0xff]  ;;  %v873_v31 = vpack.c.bf16 %v116_v24, %v100_v23  ;;  %v99_v32 = vld [vmem:[#allocation5 + $0x170] sm:$0xff]  ;;  %v118_v5 = vld [vmem:[#allocation7 + $0x8] sm:$0xff] }
  0x4c   :  { %856 = vmatpush1.bf16.msra.mxu1 %v855_v2  ;;  %850 = vmatprep.subr.bf16.mxu0 %v849_v3  ;;  %v115_v33 = vld [vmem:[#allocation5 + $0x1f0] sm:$0xff]  ;;  %v867_v34 = vpack.c.bf16 %v113_v30, %v97_v29  ;;  %v117_v39 = vld [vmem:[#allocation7] sm:$0xff]  ;;  %v164_v8 = vrot.slane %v118_v5, %v131_v40  ;;  %v160_v9 = vrot.slane %v118_v5, %v127_v41 }
  0x4d   :  { %858 = vmatprep.subr.bf16.mxu1 %v857_v7  ;;  %553 = vmatprep.mubr.f32.mxu0 %v983_v0  ;;  %v875_v35 = vpack.c.bf16 %v115_v33, %v99_v32  ;;  %v124_v42 = vrot.slane %v117_v39, %v123_v38  ;;  %v132_v43 = vrot.slane %v117_v39, %v131_v40 }
  0x4e   :  { %624 = vmatprep.mubr.f32.mxu1 %v983_v0  ;;  %v128_v44 = vrot.slane %v117_v39, %v127_v41  ;;  %v140_v57 = vrot.slane %v117_v39, %v139_v49  ;;  %v148_v58 = vrot.slane %v117_v39, %v147_v53  ;;  %v144_v59 = vrot.slane %v117_v39, %v143_v54 }
  0x4f   :  { %852 = vmatpush1.bf16.msra.mxu0 %v851_v13  ;;  %v152_v60 = vrot.slane %v117_v39, %v151_v56  ;;  %v156_v7 = vrot.slane %v118_v5, %v123_v38  ;;  %v180_v20 = vrot.slane %v118_v5, %v147_v53  ;;  %v176_v21 = vrot.slane %v118_v5, %v143_v54 }
  0x50   :  { %860 = vmatpush1.bf16.msra.mxu1 %v859_v14  ;;  %862 = vmatprep.subr.bf16.mxu0 %v861_v15  ;;  %v184_v22 = vrot.slane %v118_v5, %v151_v56 }
  0x51   :  { %870 = vmatprep.subr.bf16.mxu1 %v869_v19  ;;  %v172_v19 = vrot.slane %v118_v5, %v139_v49 }
  0x52   :  { %809 = vmatmul.mubr.msk.f32.vlgmr.msra.gmra.mrb[4].mxu0 %vm201_vm0, %v1043_v26 }
  0x53   :  { %810 = vmatmul.mubr.msk.f32.vlgmr.msra.gmra.mrb[4].mxu1 %vm201_vm0, %v1043_v26  ;;  %864 = vmatpush1.bf16.msra.mxu0 %v863_v25 }
  0x54   :  { %872 = vmatpush1.bf16.msra.mxu1 %v871_v27  ;;  %866 = vmatprep.subr.bf16.mxu0 %v865_v28 }
  0x55   :  { %874 = vmatprep.subr.bf16.mxu1 %v873_v31  ;;  %695 = vmatprep.mubr.f32.mxu0 %v983_v0 }
  0x56   :  { %766 = vmatprep.mubr.f32.mxu1 %v983_v0  ;;  %v135_v0 = vsub.s32 3, %v1067_v37 }
  0x57   :  { %868 = vmatpush1.bf16.msra.mxu0 %v867_v34 }
  0x58   :  { %876 = vmatpush1.bf16.msra.mxu1 %v875_v35  ;;  %v136_v45 = vrot.slane %v117_v39, %v135_v0  ;;  %v168_v10 = vrot.slane %v118_v5, %v135_v0 }
  0x5a   :  { %811 = vmatmul.mubr.msk.f32.vlgmr.msra.gmra.mrb[6].mxu0 %vm201_vm0, %v1043_v26 }
  0x5b   :  { %812 = vmatmul.mubr.msk.f32.vlgmr.msra.gmra.mrb[6].mxu1 %vm201_vm0, %v1043_v26 }
 0x115   :  { %v271_v46 = vpop.f32.mrb[0].mxu0 }
 0x116   :  { %v272_v47 = vadd.f32 %v271_v46, %v124_v42  ;;  %v342_v48 = vpop.f32.mrb[0].mxu1  ;;  %v273_v26 = vpop.f32.mrb[1].mxu0 }
 0x117   :  { %v343_v50 = vadd.f32 %v342_v48, %v132_v43  ;;  %v274_v51 = vadd.f32 %v273_v26, %v128_v44  ;;  %v344_v52 = vpop.f32.mrb[1].mxu1 }
 0x118   :  { %773 = vst [vmem:[#allocation8] sm:$0xff] %v272_v47  ;;  %v345_v55 = vadd.f32 %v344_v52, %v136_v45 }
 0x119   :  { %775 = vst [vmem:[#allocation8 + $0x10] sm:$0xff] %v343_v50  ;;  %774 = vst [vmem:[#allocation8 + $0x8] sm:$0xff] %v274_v51 }
 0x11a   :  { %776 = vst [vmem:[#allocation8 + $0x18] sm:$0xff] %v345_v55 }
 0x11d   :  { %v413_v61 = vpop.f32.mrb[2].mxu0 }
 0x11e   :  { %v414_v62 = vadd.f32 %v413_v61, %v140_v57  ;;  %v484_v63 = vpop.f32.mrb[2].mxu1  ;;  %v415_v1 = vpop.f32.mrb[3].mxu0 }
 0x11f   :  { %v485_v2 = vadd.f32 %v484_v63, %v148_v58  ;;  %v416_v3 = vadd.f32 %v415_v1, %v144_v59  ;;  %v486_v4 = vpop.f32.mrb[3].mxu1 }
 0x120   :  { %777 = vst [vmem:[#allocation8 + $0x20] sm:$0xff] %v414_v62  ;;  %v487_v6 = vadd.f32 %v486_v4, %v152_v60 }
 0x121   :  { %779 = vst [vmem:[#allocation8 + $0x30] sm:$0xff] %v485_v2  ;;  %778 = vst [vmem:[#allocation8 + $0x28] sm:$0xff] %v416_v3 }
 0x122   :  { %780 = vst [vmem:[#allocation8 + $0x38] sm:$0xff] %v487_v6 }
 0x125   :  { %v555_v11 = vpop.f32.mrb[4].mxu0 }
 0x126   :  { %v556_v12 = vadd.f32 %v555_v11, %v156_v7  ;;  %v626_v13 = vpop.f32.mrb[4].mxu1  ;;  %v557_v14 = vpop.f32.mrb[5].mxu0 }
 0x127   :  { %v627_v15 = vadd.f32 %v626_v13, %v164_v8  ;;  %v558_v16 = vadd.f32 %v557_v14, %v160_v9  ;;  %v628_v17 = vpop.f32.mrb[5].mxu1 }
 0x128   :  { %781 = vst [vmem:[#allocation8 + $0x40] sm:$0xff] %v556_v12  ;;  %v629_v18 = vadd.f32 %v628_v17, %v168_v10 }
 0x129   :  { %783 = vst [vmem:[#allocation8 + $0x50] sm:$0xff] %v627_v15  ;;  %782 = vst [vmem:[#allocation8 + $0x48] sm:$0xff] %v558_v16 }
 0x12a   :  { %784 = vst [vmem:[#allocation8 + $0x58] sm:$0xff] %v629_v18 }
 0x12d   :  { %v697_v23 = vpop.f32.mrb[6].mxu0 }
 0x12e   :  { %v698_v24 = vadd.f32 %v697_v23, %v172_v19  ;;  %v768_v25 = vpop.f32.mrb[6].mxu1  ;;  %v699_v27 = vpop.f32.mrb[7].mxu0 }
 0x12f   :  { %v769_v28 = vadd.f32 %v768_v25, %v180_v20  ;;  %v700_v29 = vadd.f32 %v699_v27, %v176_v21  ;;  %v770_v30 = vpop.f32.mrb[7].mxu1 }
 0x130   :  { %785 = vst [vmem:[#allocation8 + $0x60] sm:$0xff] %v698_v24  ;;  %v771_v31 = vadd.f32 %v770_v30, %v184_v22 }
 0x131   :  { %787 = vst [vmem:[#allocation8 + $0x70] sm:$0xff] %v769_v28  ;;  %786 = vst [vmem:[#allocation8 + $0x68] sm:$0xff] %v700_v29 }
 0x132   :  { %788 = vst [vmem:[#allocation8 + $0x78] sm:$0xff] %v771_v31 }
 0x133   :  { %961 = shalt.err (!%p958_p0)
}
 0x134   :  { %s962_s25 = scalar_lea.hbm %s1092_s3, 2048 }
 0x135   :  { %p963_p1 = scmp.ne.s32.totalorder %s1092_s3, %s962_s25  ;;  %p966_p2 = scmp.lt.u32.totalorder %s962_s25, %s1092_s3 }
 0x137   :  { %p968_p3 = pnand %p966_p2, %p963_p1 }
 0x139   :  { %971 = shalt.err (!%p968_p3)
}
 0x13a   :  { %798 = dma.vmem_to_hbm [thread:$0]  %s796_s21, 2048, %s1092_s3, [#allocation4]  }
 0x13b   :  { %976 = dma.done.wait [#allocation4], 2048  }
 0x13c   :  { %977 = vsyncadd [#allocation4], 4294965248 }
 0x13d   :  { %802 = vsyncpa [#allocation3], 1 }
 0x13e   :  { %803 = vsyncpa [#allocation6], 1 }
 0x13f   :  { %804 = vsyncpa [#allocation4], 1 }

</bundles_post_ra>
